<compile_context>
chip_gen: v6e
topology: v6e:2x2x1
jax: 0.10.0
libtpu: 0.0.40
codegen_flags: <defaults>
</compile_context>

<pallas_src>
import functools

import jax
import jax.numpy as jnp
from jax.experimental import pallas as pl
from jax.experimental.pallas import tpu as pltpu


def _decoder_kernel(x_ref, h0_ref, wih_ref, whh_ref, bgi_ref, bhhn_ref,
                    wout_ref, bout_ref,
                    out_ref, hout_ref,
                    gi_seq, h_seq,
                    *, seq_len, batch, hidden_size):
    L, B, H = seq_len, batch, hidden_size

    # (1) Hoisted, time-parallel input path: sigmoid(x.float()) then ONE matmul
    #     over all L*B rows.  b_ih (and b_hh for the r/z gates) are pre-folded
    #     into bgi by the wrapper.
    x = jax.nn.sigmoid(x_ref[...].astype(jnp.float32))                      # (L*B, D)
    gi_seq[...] = (jnp.dot(x, wih_ref[...], preferred_element_type=jnp.float32)
                   + bgi_ref[...])                                          # (L*B, 3H)

    # Loop-invariant loads / broadcasts hoisted out of the recurrence
    # (JAX does not CSE broadcast_in_dim).
    whh = whh_ref[...]                                                      # (H, 3H)
    bhh_n = jnp.broadcast_to(bhhn_ref[...], (B, H))                         # (B, H)

    h = h0_ref[...].astype(jnp.float32)                                     # (B, H)

    # (2) Sequential GRU recurrence.  L is a small static trip count, so a Python
    #     loop fully unrolls at trace time with concrete indices -> every ref
    #     slice below is static (equivalent of lax.fori_loop(..., unroll=True)
    #     at this trip count, but with guaranteed-static slicing).
    for t in range(L):
        gi = gi_seq[pl.ds(t * B, B), :]                                     # (B, 3H)
        gh = jnp.dot(h, whh, preferred_element_type=jnp.float32)            # (B, 3H), bias-free
        r = jax.nn.sigmoid(gi[:, 0 * H:1 * H] + gh[:, 0 * H:1 * H])
        z = jax.nn.sigmoid(gi[:, 1 * H:2 * H] + gh[:, 1 * H:2 * H])
        n = jnp.tanh(gi[:, 2 * H:3 * H] + r * (gh[:, 2 * H:3 * H] + bhh_n))
        h = (1.0 - z) * n + z * h
        h_seq[pl.ds(t * B, B), :] = h                                       # stash h_t

    # (3) Deferred output Linear (dropout is identity in eval mode):
    #     one (L*B, H) x (H, Dp) matmul, single lane-dense store of the whole slab.
    o = (jnp.dot(h_seq[...], wout_ref[...], preferred_element_type=jnp.float32)
         + bout_ref[...])
    out_ref[...] = o.astype(out_ref.dtype)                                  # (L*B, Dp)
    hout_ref[...] = h.astype(hout_ref.dtype)                                # final hidden, once


def decoder_rnn_numerical(x, h0, params, *, hidden_size, output_size):
    """x: (L, B, output_size), h0: (1, B, hidden_size)
       -> (out (L, B, output_size), h (1, B, hidden_size))."""
    L, B, D = x.shape
    H = hidden_size
    assert D == output_size
    assert h0.shape == (1, B, H)

    Dp = pl.cdiv(D, 128) * 128  # lane-dense padded output width

    # Weight / bias prep (layout plumbing only; all compute stays in the kernel).
    wih_t = params["w_ih"].T.astype(jnp.float32)                      # (D, 3H)
    whh_t = params["w_hh"].T.astype(jnp.float32)                      # (H, 3H)
    # Fold b_ih fully, plus the r/z slices of b_hh, into the hoisted projection;
    # the n-gate slice of b_hh must stay inside r * (.) so it is passed separately.
    b_gi = (params["b_ih"]
            + jnp.concatenate([params["b_hh"][:2 * H],
                               jnp.zeros((H,), jnp.float32)]))[None, :]   # (1, 3H)
    b_hh_n = params["b_hh"][2 * H:][None, :]                          # (1, H)
    wout_t = jnp.pad(params["w_out"].T.astype(jnp.float32),
                     ((0, 0), (0, Dp - D)))                           # (H, Dp)
    b_out = jnp.pad(params["b_out"].astype(jnp.float32),
                    (0, Dp - D))[None, :]                             # (1, Dp)

    x2d = x.reshape(L * B, D)      # (t, b) rows, row-major: row = t*B + b
    h0_2d = h0[0]                  # (B, H)

    kernel = functools.partial(_decoder_kernel, seq_len=L, batch=B, hidden_size=H)

    out2d, h_last = pl.pallas_call(
        kernel,
        out_shape=(
            jax.ShapeDtypeStruct((L * B, Dp), jnp.float32),
            jax.ShapeDtypeStruct((B, H), jnp.float32),
        ),
        grid_spec=pltpu.PrefetchScalarGridSpec(
            num_scalar_prefetch=0,
            grid=(1,),                                            # single grid point
            in_specs=[
                pl.BlockSpec((L * B, D), lambda i: (0, 0)),       # sigmoid input rows
                pl.BlockSpec((B, H), lambda i: (0, 0)),           # h0
                pl.BlockSpec((D, 3 * H), lambda i: (0, 0)),       # W_ih^T
                pl.BlockSpec((H, 3 * H), lambda i: (0, 0)),       # W_hh^T
                pl.BlockSpec((1, 3 * H), lambda i: (0, 0)),       # folded gi bias
                pl.BlockSpec((1, H), lambda i: (0, 0)),           # b_hh (n gate)
                pl.BlockSpec((H, Dp), lambda i: (0, 0)),          # W_out^T (lane-padded)
                pl.BlockSpec((1, Dp), lambda i: (0, 0)),          # b_out (lane-padded)
            ],
            out_specs=[
                pl.BlockSpec((L * B, Dp), lambda i: (0, 0)),      # output slab (once)
                pl.BlockSpec((B, H), lambda i: (0, 0)),           # final hidden (once)
            ],
            scratch_shapes=[
                pltpu.VMEM((L * B, 3 * H), jnp.float32),          # hoisted gi for all t
                pltpu.VMEM((L * B, H), jnp.float32),              # all h_t for deferred Linear
            ],
        ),
        compiler_params=pltpu.CompilerParams(
            dimension_semantics=("arbitrary",),
        ),
    )(x2d, h0_2d, wih_t, whh_t, b_gi, b_hh_n, wout_t, b_out)

    out = out2d[:, :D].reshape(L, B, D)
    return out, h_last[None]


def _reference(x, h0, params, hidden_size):
    """Pure-JAX reference of the PyTorch forward (eval-mode dropout)."""
    H = hidden_size
    w_ih, w_hh = params["w_ih"], params["w_hh"]
    b_ih, b_hh = params["b_ih"], params["b_hh"]
    w_out, b_out = params["w_out"], params["b_out"]

    def step(h, x_t):
        xs = jax.nn.sigmoid(x_t.astype(jnp.float32))
        gi = xs @ w_ih.T + b_ih
        gh = h @ w_hh.T + b_hh
        r = jax.nn.sigmoid(gi[:, :H] + gh[:, :H])
        z = jax.nn.sigmoid(gi[:, H:2 * H] + gh[:, H:2 * H])
        n = jnp.tanh(gi[:, 2 * H:] + r * gh[:, 2 * H:])
        h_new = (1.0 - z) * n + z * h
        return h_new, h_new @ w_out.T + b_out

    h_last, outs = jax.lax.scan(step, h0[0], x)
    return outs, h_last[None]


if __name__ == "__main__":
    hidden_size = 32
    output_size = 4
    seq_len = 8
    batch = 2

    key = jax.random.PRNGKey(0)
    ks = jax.random.split(key, 8)
    scale = 1.0 / jnp.sqrt(hidden_size)

    params = {
        "w_ih": jax.random.uniform(ks[0], (3 * hidden_size, output_size), jnp.float32, -scale, scale),
        "w_hh": jax.random.uniform(ks[1], (3 * hidden_size, hidden_size), jnp.float32, -scale, scale),
        "b_ih": jax.random.uniform(ks[2], (3 * hidden_size,), jnp.float32, -scale, scale),
        "b_hh": jax.random.uniform(ks[3], (3 * hidden_size,), jnp.float32, -scale, scale),
        "w_out": jax.random.uniform(ks[4], (output_size, hidden_size), jnp.float32, -scale, scale),
        "b_out": jax.random.uniform(ks[5], (output_size,), jnp.float32, -scale, scale),
    }

    x = jax.random.normal(ks[6], (seq_len, batch, output_size), jnp.float32)
    h0 = jax.random.normal(ks[7], (1, batch, hidden_size), jnp.float32)

    out, h_final = decoder_rnn_numerical(
        x, h0, params, hidden_size=hidden_size, output_size=output_size)
    out = jax.block_until_ready(out)
    h_final = jax.block_until_ready(h_final)

    ref_out, ref_h = _reference(x, h0, params, hidden_size)
    assert jnp.allclose(out, ref_out, atol=1e-5, rtol=1e-5)
    assert jnp.allclose(h_final, ref_h, atol=1e-5, rtol=1e-5)

    print("KERNEL_OK")
</pallas_src>

<mosaic_0001>
module attributes {stable_mosaic.version = 11 : i64} {
  func.func @_decoder_kernel(%arg0: i32, %arg1: memref<16x4xf32, #tpu.memory_space<vmem>>, %arg2: memref<2x32xf32, #tpu.memory_space<vmem>>, %arg3: memref<4x96xf32, #tpu.memory_space<vmem>>, %arg4: memref<32x96xf32, #tpu.memory_space<vmem>>, %arg5: memref<1x96xf32, #tpu.memory_space<vmem>>, %arg6: memref<1x32xf32, #tpu.memory_space<vmem>>, %arg7: memref<32x128xf32, #tpu.memory_space<vmem>>, %arg8: memref<1x128xf32, #tpu.memory_space<vmem>>, %arg9: memref<16x128xf32, #tpu.memory_space<vmem>>, %arg10: memref<2x32xf32, #tpu.memory_space<vmem>>, %arg11: memref<16x96xf32, #tpu.memory_space<vmem>>, %arg12: memref<16x32xf32, #tpu.memory_space<vmem>>) attributes {dimension_semantics = [#tpu.dimension_semantics<arbitrary>], iteration_bounds = array<i64: 1>, scalar_prefetch = 0 : i64, scratch_operands = 2 : i64, tpu.core_type = #tpu.core_type<tc>, window_params = [{pipeline_mode = #tpu.pipeline_mode<synchronous>, transform_indices = @transform_0, window_bounds = array<i64: 16, 4>}, {pipeline_mode = #tpu.pipeline_mode<synchronous>, transform_indices = @transform_1, window_bounds = array<i64: 2, 32>}, {pipeline_mode = #tpu.pipeline_mode<synchronous>, transform_indices = @transform_2, window_bounds = array<i64: 4, 96>}, {pipeline_mode = #tpu.pipeline_mode<synchronous>, transform_indices = @transform_3, window_bounds = array<i64: 32, 96>}, {pipeline_mode = #tpu.pipeline_mode<synchronous>, transform_indices = @transform_4, window_bounds = array<i64: 1, 96>}, {pipeline_mode = #tpu.pipeline_mode<synchronous>, transform_indices = @transform_5, window_bounds = array<i64: 1, 32>}, {pipeline_mode = #tpu.pipeline_mode<synchronous>, transform_indices = @transform_6, window_bounds = array<i64: 32, 128>}, {pipeline_mode = #tpu.pipeline_mode<synchronous>, transform_indices = @transform_7, window_bounds = array<i64: 1, 128>}, {pipeline_mode = #tpu.pipeline_mode<synchronous>, transform_indices = @transform_8, window_bounds = array<i64: 16, 128>}, {pipeline_mode = #tpu.pipeline_mode<synchronous>, transform_indices = @transform_9, window_bounds = array<i64: 2, 32>}]} {
    %c0 = arith.constant 0 : index
    %c0_0 = arith.constant 0 : index
    %0 = vector.load %arg1[%c0, %c0_0] : memref<16x4xf32, #tpu.memory_space<vmem>>, vector<16x4xf32>
    %1 = arith.negf %0 : vector<16x4xf32>
    %2 = math.exp %1 : vector<16x4xf32>
    %cst = arith.constant 1.000000e+00 : f32
    %3 = vector.broadcast %cst : f32 to vector<16x4xf32>
    %4 = arith.addf %3, %2 : vector<16x4xf32>
    %5 = arith.divf %3, %4 : vector<16x4xf32>
    %c0_1 = arith.constant 0 : index
    %c0_2 = arith.constant 0 : index
    %6 = vector.load %arg3[%c0_1, %c0_2] : memref<4x96xf32, #tpu.memory_space<vmem>>, vector<4x96xf32>
    %cst_3 = arith.constant dense<0.000000e+00> : vector<16x96xf32>
    %7 = tpu.matmul %5, %6, %cst_3 {dimension_numbers = #tpu.dot_dimension_numbers<[1], [0], [0], [1], [0, 0, 1, 1], [], []>} : vector<16x4xf32>, vector<4x96xf32>, vector<16x96xf32> -> vector<16x96xf32>
    %c0_4 = arith.constant 0 : index
    %c0_5 = arith.constant 0 : index
    %8 = vector.load %arg5[%c0_4, %c0_5] : memref<1x96xf32, #tpu.memory_space<vmem>>, vector<1x96xf32>
    %9 = vector.broadcast %8 : vector<1x96xf32> to vector<16x96xf32>
    %10 = arith.addf %7, %9 : vector<16x96xf32>
    %c0_6 = arith.constant 0 : index
    %c0_7 = arith.constant 0 : index
    %11 = vector.load %arg11[%c0_6, %c0_7] : memref<16x96xf32, #tpu.memory_space<vmem>>, vector<16x96xf32>
    tpu.vector_store %arg11[%c0_6, %c0_7], %10 {strides = array<i32>} : memref<16x96xf32, #tpu.memory_space<vmem>>, vector<16x96xf32>,
    %c0_8 = arith.constant 0 : index
    %c0_9 = arith.constant 0 : index
    %12 = vector.load %arg4[%c0_8, %c0_9] : memref<32x96xf32, #tpu.memory_space<vmem>>, vector<32x96xf32>
    %c0_10 = arith.constant 0 : index
    %c0_11 = arith.constant 0 : index
    %13 = vector.load %arg6[%c0_10, %c0_11] : memref<1x32xf32, #tpu.memory_space<vmem>>, vector<1x32xf32>
    %14 = vector.shape_cast %13 : vector<1x32xf32> to vector<1x32xf32>
    %15 = vector.broadcast %14 : vector<1x32xf32> to vector<2x32xf32>
    %c0_12 = arith.constant 0 : index
    %c0_13 = arith.constant 0 : index
    %16 = vector.load %arg2[%c0_12, %c0_13] : memref<2x32xf32, #tpu.memory_space<vmem>>, vector<2x32xf32>
    %c0_14 = arith.constant 0 : index
    %c0_15 = arith.constant 0 : index
    %17 = vector.load %arg11[%c0_14, %c0_15] : memref<16x96xf32, #tpu.memory_space<vmem>>, vector<2x96xf32>
    %cst_16 = arith.constant dense<0.000000e+00> : vector<2x96xf32>
    %18 = tpu.matmul %16, %12, %cst_16 {dimension_numbers = #tpu.dot_dimension_numbers<[1], [0], [0], [1], [0, 0, 1, 1], [], []>} : vector<2x32xf32>, vector<32x96xf32>, vector<2x96xf32> -> vector<2x96xf32>
    %19 = vector.extract_strided_slice %17 {offsets = [0, 0], sizes = [2, 32], strides = [1, 1]} : vector<2x96xf32> to vector<2x32xf32>
    %20 = vector.extract_strided_slice %18 {offsets = [0, 0], sizes = [2, 32], strides = [1, 1]} : vector<2x96xf32> to vector<2x32xf32>
    %21 = arith.addf %19, %20 : vector<2x32xf32>
    %22 = arith.negf %21 : vector<2x32xf32>
    %23 = math.exp %22 : vector<2x32xf32>
    %cst_17 = arith.constant 1.000000e+00 : f32
    %24 = vector.broadcast %cst_17 : f32 to vector<2x32xf32>
    %25 = arith.addf %24, %23 : vector<2x32xf32>
    %26 = arith.divf %24, %25 : vector<2x32xf32>
    %27 = vector.extract_strided_slice %17 {offsets = [0, 32], sizes = [2, 32], strides = [1, 1]} : vector<2x96xf32> to vector<2x32xf32>
    %28 = vector.extract_strided_slice %18 {offsets = [0, 32], sizes = [2, 32], strides = [1, 1]} : vector<2x96xf32> to vector<2x32xf32>
    %29 = arith.addf %27, %28 : vector<2x32xf32>
    %30 = arith.negf %29 : vector<2x32xf32>
    %31 = math.exp %30 : vector<2x32xf32>
    %cst_18 = arith.constant 1.000000e+00 : f32
    %32 = vector.broadcast %cst_18 : f32 to vector<2x32xf32>
    %33 = arith.addf %32, %31 : vector<2x32xf32>
    %34 = arith.divf %32, %33 : vector<2x32xf32>
    %35 = vector.extract_strided_slice %17 {offsets = [0, 64], sizes = [2, 32], strides = [1, 1]} : vector<2x96xf32> to vector<2x32xf32>
    %36 = vector.extract_strided_slice %18 {offsets = [0, 64], sizes = [2, 32], strides = [1, 1]} : vector<2x96xf32> to vector<2x32xf32>
    %37 = arith.addf %36, %15 : vector<2x32xf32>
    %38 = arith.mulf %26, %37 : vector<2x32xf32>
    %39 = arith.addf %35, %38 : vector<2x32xf32>
    %40 = math.tanh %39 : vector<2x32xf32>
    %cst_19 = arith.constant 1.000000e+00 : f32
    %41 = vector.broadcast %cst_19 : f32 to vector<2x32xf32>
    %42 = arith.subf %41, %34 : vector<2x32xf32>
    %43 = arith.mulf %42, %40 : vector<2x32xf32>
    %44 = arith.mulf %34, %16 : vector<2x32xf32>
    %45 = arith.addf %43, %44 : vector<2x32xf32>
    %c0_20 = arith.constant 0 : index
    %c0_21 = arith.constant 0 : index
    %46 = vector.load %arg12[%c0_20, %c0_21] : memref<16x32xf32, #tpu.memory_space<vmem>>, vector<2x32xf32>
    tpu.vector_store %arg12[%c0_20, %c0_21], %45 {strides = array<i32>} : memref<16x32xf32, #tpu.memory_space<vmem>>, vector<2x32xf32>,
    %c2 = arith.constant 2 : index
    %c0_22 = arith.constant 0 : index
    %47 = vector.load %arg11[%c2, %c0_22] : memref<16x96xf32, #tpu.memory_space<vmem>>, vector<2x96xf32>
    %cst_23 = arith.constant dense<0.000000e+00> : vector<2x96xf32>
    %48 = tpu.matmul %45, %12, %cst_23 {dimension_numbers = #tpu.dot_dimension_numbers<[1], [0], [0], [1], [0, 0, 1, 1], [], []>} : vector<2x32xf32>, vector<32x96xf32>, vector<2x96xf32> -> vector<2x96xf32>
    %49 = vector.extract_strided_slice %47 {offsets = [0, 0], sizes = [2, 32], strides = [1, 1]} : vector<2x96xf32> to vector<2x32xf32>
    %50 = vector.extract_strided_slice %48 {offsets = [0, 0], sizes = [2, 32], strides = [1, 1]} : vector<2x96xf32> to vector<2x32xf32>
    %51 = arith.addf %49, %50 : vector<2x32xf32>
    %52 = arith.negf %51 : vector<2x32xf32>
    %53 = math.exp %52 : vector<2x32xf32>
    %cst_24 = arith.constant 1.000000e+00 : f32
    %54 = vector.broadcast %cst_24 : f32 to vector<2x32xf32>
    %55 = arith.addf %54, %53 : vector<2x32xf32>
    %56 = arith.divf %54, %55 : vector<2x32xf32>
    %57 = vector.extract_strided_slice %47 {offsets = [0, 32], sizes = [2, 32], strides = [1, 1]} : vector<2x96xf32> to vector<2x32xf32>
    %58 = vector.extract_strided_slice %48 {offsets = [0, 32], sizes = [2, 32], strides = [1, 1]} : vector<2x96xf32> to vector<2x32xf32>
    %59 = arith.addf %57, %58 : vector<2x32xf32>
    %60 = arith.negf %59 : vector<2x32xf32>
    %61 = math.exp %60 : vector<2x32xf32>
    %cst_25 = arith.constant 1.000000e+00 : f32
    %62 = vector.broadcast %cst_25 : f32 to vector<2x32xf32>
    %63 = arith.addf %62, %61 : vector<2x32xf32>
    %64 = arith.divf %62, %63 : vector<2x32xf32>
    %65 = vector.extract_strided_slice %47 {offsets = [0, 64], sizes = [2, 32], strides = [1, 1]} : vector<2x96xf32> to vector<2x32xf32>
    %66 = vector.extract_strided_slice %48 {offsets = [0, 64], sizes = [2, 32], strides = [1, 1]} : vector<2x96xf32> to vector<2x32xf32>
    %67 = arith.addf %66, %15 : vector<2x32xf32>
    %68 = arith.mulf %56, %67 : vector<2x32xf32>
    %69 = arith.addf %65, %68 : vector<2x32xf32>
    %70 = math.tanh %69 : vector<2x32xf32>
    %cst_26 = arith.constant 1.000000e+00 : f32
    %71 = vector.broadcast %cst_26 : f32 to vector<2x32xf32>
    %72 = arith.subf %71, %64 : vector<2x32xf32>
    %73 = arith.mulf %72, %70 : vector<2x32xf32>
    %74 = arith.mulf %64, %45 : vector<2x32xf32>
    %75 = arith.addf %73, %74 : vector<2x32xf32>
    %c2_27 = arith.constant 2 : index
    %c0_28 = arith.constant 0 : index
    %76 = vector.load %arg12[%c2_27, %c0_28] : memref<16x32xf32, #tpu.memory_space<vmem>>, vector<2x32xf32>
    tpu.vector_store %arg12[%c2_27, %c0_28], %75 {strides = array<i32>} : memref<16x32xf32, #tpu.memory_space<vmem>>, vector<2x32xf32>,
    %c4 = arith.constant 4 : index
    %c0_29 = arith.constant 0 : index
    %77 = vector.load %arg11[%c4, %c0_29] : memref<16x96xf32, #tpu.memory_space<vmem>>, vector<2x96xf32>
    %cst_30 = arith.constant dense<0.000000e+00> : vector<2x96xf32>
    %78 = tpu.matmul %75, %12, %cst_30 {dimension_numbers = #tpu.dot_dimension_numbers<[1], [0], [0], [1], [0, 0, 1, 1], [], []>} : vector<2x32xf32>, vector<32x96xf32>, vector<2x96xf32> -> vector<2x96xf32>
    %79 = vector.extract_strided_slice %77 {offsets = [0, 0], sizes = [2, 32], strides = [1, 1]} : vector<2x96xf32> to vector<2x32xf32>
    %80 = vector.extract_strided_slice %78 {offsets = [0, 0], sizes = [2, 32], strides = [1, 1]} : vector<2x96xf32> to vector<2x32xf32>
    %81 = arith.addf %79, %80 : vector<2x32xf32>
    %82 = arith.negf %81 : vector<2x32xf32>
    %83 = math.exp %82 : vector<2x32xf32>
    %cst_31 = arith.constant 1.000000e+00 : f32
    %84 = vector.broadcast %cst_31 : f32 to vector<2x32xf32>
    %85 = arith.addf %84, %83 : vector<2x32xf32>
    %86 = arith.divf %84, %85 : vector<2x32xf32>
    %87 = vector.extract_strided_slice %77 {offsets = [0, 32], sizes = [2, 32], strides = [1, 1]} : vector<2x96xf32> to vector<2x32xf32>
    %88 = vector.extract_strided_slice %78 {offsets = [0, 32], sizes = [2, 32], strides = [1, 1]} : vector<2x96xf32> to vector<2x32xf32>
    %89 = arith.addf %87, %88 : vector<2x32xf32>
    %90 = arith.negf %89 : vector<2x32xf32>
    %91 = math.exp %90 : vector<2x32xf32>
    %cst_32 = arith.constant 1.000000e+00 : f32
    %92 = vector.broadcast %cst_32 : f32 to vector<2x32xf32>
    %93 = arith.addf %92, %91 : vector<2x32xf32>
    %94 = arith.divf %92, %93 : vector<2x32xf32>
    %95 = vector.extract_strided_slice %77 {offsets = [0, 64], sizes = [2, 32], strides = [1, 1]} : vector<2x96xf32> to vector<2x32xf32>
    %96 = vector.extract_strided_slice %78 {offsets = [0, 64], sizes = [2, 32], strides = [1, 1]} : vector<2x96xf32> to vector<2x32xf32>
    %97 = arith.addf %96, %15 : vector<2x32xf32>
    %98 = arith.mulf %86, %97 : vector<2x32xf32>
    %99 = arith.addf %95, %98 : vector<2x32xf32>
    %100 = math.tanh %99 : vector<2x32xf32>
    %cst_33 = arith.constant 1.000000e+00 : f32
    %101 = vector.broadcast %cst_33 : f32 to vector<2x32xf32>
    %102 = arith.subf %101, %94 : vector<2x32xf32>
    %103 = arith.mulf %102, %100 : vector<2x32xf32>
    %104 = arith.mulf %94, %75 : vector<2x32xf32>
    %105 = arith.addf %103, %104 : vector<2x32xf32>
    %c4_34 = arith.constant 4 : index
    %c0_35 = arith.constant 0 : index
    %106 = vector.load %arg12[%c4_34, %c0_35] : memref<16x32xf32, #tpu.memory_space<vmem>>, vector<2x32xf32>
    tpu.vector_store %arg12[%c4_34, %c0_35], %105 {strides = array<i32>} : memref<16x32xf32, #tpu.memory_space<vmem>>, vector<2x32xf32>,
    %c6 = arith.constant 6 : index
    %c0_36 = arith.constant 0 : index
    %107 = vector.load %arg11[%c6, %c0_36] : memref<16x96xf32, #tpu.memory_space<vmem>>, vector<2x96xf32>
    %cst_37 = arith.constant dense<0.000000e+00> : vector<2x96xf32>
    %108 = tpu.matmul %105, %12, %cst_37 {dimension_numbers = #tpu.dot_dimension_numbers<[1], [0], [0], [1], [0, 0, 1, 1], [], []>} : vector<2x32xf32>, vector<32x96xf32>, vector<2x96xf32> -> vector<2x96xf32>
    %109 = vector.extract_strided_slice %107 {offsets = [0, 0], sizes = [2, 32], strides = [1, 1]} : vector<2x96xf32> to vector<2x32xf32>
    %110 = vector.extract_strided_slice %108 {offsets = [0, 0], sizes = [2, 32], strides = [1, 1]} : vector<2x96xf32> to vector<2x32xf32>
    %111 = arith.addf %109, %110 : vector<2x32xf32>
    %112 = arith.negf %111 : vector<2x32xf32>
    %113 = math.exp %112 : vector<2x32xf32>
    %cst_38 = arith.constant 1.000000e+00 : f32
    %114 = vector.broadcast %cst_38 : f32 to vector<2x32xf32>
    %115 = arith.addf %114, %113 : vector<2x32xf32>
    %116 = arith.divf %114, %115 : vector<2x32xf32>
    %117 = vector.extract_strided_slice %107 {offsets = [0, 32], sizes = [2, 32], strides = [1, 1]} : vector<2x96xf32> to vector<2x32xf32>
    %118 = vector.extract_strided_slice %108 {offsets = [0, 32], sizes = [2, 32], strides = [1, 1]} : vector<2x96xf32> to vector<2x32xf32>
    %119 = arith.addf %117, %118 : vector<2x32xf32>
    %120 = arith.negf %119 : vector<2x32xf32>
    %121 = math.exp %120 : vector<2x32xf32>
    %cst_39 = arith.constant 1.000000e+00 : f32
    %122 = vector.broadcast %cst_39 : f32 to vector<2x32xf32>
    %123 = arith.addf %122, %121 : vector<2x32xf32>
    %124 = arith.divf %122, %123 : vector<2x32xf32>
    %125 = vector.extract_strided_slice %107 {offsets = [0, 64], sizes = [2, 32], strides = [1, 1]} : vector<2x96xf32> to vector<2x32xf32>
    %126 = vector.extract_strided_slice %108 {offsets = [0, 64], sizes = [2, 32], strides = [1, 1]} : vector<2x96xf32> to vector<2x32xf32>
    %127 = arith.addf %126, %15 : vector<2x32xf32>
    %128 = arith.mulf %116, %127 : vector<2x32xf32>
    %129 = arith.addf %125, %128 : vector<2x32xf32>
    %130 = math.tanh %129 : vector<2x32xf32>
    %cst_40 = arith.constant 1.000000e+00 : f32
    %131 = vector.broadcast %cst_40 : f32 to vector<2x32xf32>
    %132 = arith.subf %131, %124 : vector<2x32xf32>
    %133 = arith.mulf %132, %130 : vector<2x32xf32>
    %134 = arith.mulf %124, %105 : vector<2x32xf32>
    %135 = arith.addf %133, %134 : vector<2x32xf32>
    %c6_41 = arith.constant 6 : index
    %c0_42 = arith.constant 0 : index
    %136 = vector.load %arg12[%c6_41, %c0_42] : memref<16x32xf32, #tpu.memory_space<vmem>>, vector<2x32xf32>
    tpu.vector_store %arg12[%c6_41, %c0_42], %135 {strides = array<i32>} : memref<16x32xf32, #tpu.memory_space<vmem>>, vector<2x32xf32>,
    %c8 = arith.constant 8 : index
    %c0_43 = arith.constant 0 : index
    %137 = vector.load %arg11[%c8, %c0_43] : memref<16x96xf32, #tpu.memory_space<vmem>>, vector<2x96xf32>
    %cst_44 = arith.constant dense<0.000000e+00> : vector<2x96xf32>
    %138 = tpu.matmul %135, %12, %cst_44 {dimension_numbers = #tpu.dot_dimension_numbers<[1], [0], [0], [1], [0, 0, 1, 1], [], []>} : vector<2x32xf32>, vector<32x96xf32>, vector<2x96xf32> -> vector<2x96xf32>
    %139 = vector.extract_strided_slice %137 {offsets = [0, 0], sizes = [2, 32], strides = [1, 1]} : vector<2x96xf32> to vector<2x32xf32>
    %140 = vector.extract_strided_slice %138 {offsets = [0, 0], sizes = [2, 32], strides = [1, 1]} : vector<2x96xf32> to vector<2x32xf32>
    %141 = arith.addf %139, %140 : vector<2x32xf32>
    %142 = arith.negf %141 : vector<2x32xf32>
    %143 = math.exp %142 : vector<2x32xf32>
    %cst_45 = arith.constant 1.000000e+00 : f32
    %144 = vector.broadcast %cst_45 : f32 to vector<2x32xf32>
    %145 = arith.addf %144, %143 : vector<2x32xf32>
    %146 = arith.divf %144, %145 : vector<2x32xf32>
    %147 = vector.extract_strided_slice %137 {offsets = [0, 32], sizes = [2, 32], strides = [1, 1]} : vector<2x96xf32> to vector<2x32xf32>
    %148 = vector.extract_strided_slice %138 {offsets = [0, 32], sizes = [2, 32], strides = [1, 1]} : vector<2x96xf32> to vector<2x32xf32>
    %149 = arith.addf %147, %148 : vector<2x32xf32>
    %150 = arith.negf %149 : vector<2x32xf32>
    %151 = math.exp %150 : vector<2x32xf32>
    %cst_46 = arith.constant 1.000000e+00 : f32
    %152 = vector.broadcast %cst_46 : f32 to vector<2x32xf32>
    %153 = arith.addf %152, %151 : vector<2x32xf32>
    %154 = arith.divf %152, %153 : vector<2x32xf32>
    %155 = vector.extract_strided_slice %137 {offsets = [0, 64], sizes = [2, 32], strides = [1, 1]} : vector<2x96xf32> to vector<2x32xf32>
    %156 = vector.extract_strided_slice %138 {offsets = [0, 64], sizes = [2, 32], strides = [1, 1]} : vector<2x96xf32> to vector<2x32xf32>
    %157 = arith.addf %156, %15 : vector<2x32xf32>
    %158 = arith.mulf %146, %157 : vector<2x32xf32>
    %159 = arith.addf %155, %158 : vector<2x32xf32>
    %160 = math.tanh %159 : vector<2x32xf32>
    %cst_47 = arith.constant 1.000000e+00 : f32
    %161 = vector.broadcast %cst_47 : f32 to vector<2x32xf32>
    %162 = arith.subf %161, %154 : vector<2x32xf32>
    %163 = arith.mulf %162, %160 : vector<2x32xf32>
    %164 = arith.mulf %154, %135 : vector<2x32xf32>
    %165 = arith.addf %163, %164 : vector<2x32xf32>
    %c8_48 = arith.constant 8 : index
    %c0_49 = arith.constant 0 : index
    %166 = vector.load %arg12[%c8_48, %c0_49] : memref<16x32xf32, #tpu.memory_space<vmem>>, vector<2x32xf32>
    tpu.vector_store %arg12[%c8_48, %c0_49], %165 {strides = array<i32>} : memref<16x32xf32, #tpu.memory_space<vmem>>, vector<2x32xf32>,
    %c10 = arith.constant 10 : index
    %c0_50 = arith.constant 0 : index
    %167 = vector.load %arg11[%c10, %c0_50] : memref<16x96xf32, #tpu.memory_space<vmem>>, vector<2x96xf32>
    %cst_51 = arith.constant dense<0.000000e+00> : vector<2x96xf32>
    %168 = tpu.matmul %165, %12, %cst_51 {dimension_numbers = #tpu.dot_dimension_numbers<[1], [0], [0], [1], [0, 0, 1, 1], [], []>} : vector<2x32xf32>, vector<32x96xf32>, vector<2x96xf32> -> vector<2x96xf32>
    %169 = vector.extract_strided_slice %167 {offsets = [0, 0], sizes = [2, 32], strides = [1, 1]} : vector<2x96xf32> to vector<2x32xf32>
    %170 = vector.extract_strided_slice %168 {offsets = [0, 0], sizes = [2, 32], strides = [1, 1]} : vector<2x96xf32> to vector<2x32xf32>
    %171 = arith.addf %169, %170 : vector<2x32xf32>
    %172 = arith.negf %171 : vector<2x32xf32>
    %173 = math.exp %172 : vector<2x32xf32>
    %cst_52 = arith.constant 1.000000e+00 : f32
    %174 = vector.broadcast %cst_52 : f32 to vector<2x32xf32>
    %175 = arith.addf %174, %173 : vector<2x32xf32>
    %176 = arith.divf %174, %175 : vector<2x32xf32>
    %177 = vector.extract_strided_slice %167 {offsets = [0, 32], sizes = [2, 32], strides = [1, 1]} : vector<2x96xf32> to vector<2x32xf32>
    %178 = vector.extract_strided_slice %168 {offsets = [0, 32], sizes = [2, 32], strides = [1, 1]} : vector<2x96xf32> to vector<2x32xf32>
    %179 = arith.addf %177, %178 : vector<2x32xf32>
    %180 = arith.negf %179 : vector<2x32xf32>
    %181 = math.exp %180 : vector<2x32xf32>
    %cst_53 = arith.constant 1.000000e+00 : f32
    %182 = vector.broadcast %cst_53 : f32 to vector<2x32xf32>
    %183 = arith.addf %182, %181 : vector<2x32xf32>
    %184 = arith.divf %182, %183 : vector<2x32xf32>
    %185 = vector.extract_strided_slice %167 {offsets = [0, 64], sizes = [2, 32], strides = [1, 1]} : vector<2x96xf32> to vector<2x32xf32>
    %186 = vector.extract_strided_slice %168 {offsets = [0, 64], sizes = [2, 32], strides = [1, 1]} : vector<2x96xf32> to vector<2x32xf32>
    %187 = arith.addf %186, %15 : vector<2x32xf32>
    %188 = arith.mulf %176, %187 : vector<2x32xf32>
    %189 = arith.addf %185, %188 : vector<2x32xf32>
    %190 = math.tanh %189 : vector<2x32xf32>
    %cst_54 = arith.constant 1.000000e+00 : f32
    %191 = vector.broadcast %cst_54 : f32 to vector<2x32xf32>
    %192 = arith.subf %191, %184 : vector<2x32xf32>
    %193 = arith.mulf %192, %190 : vector<2x32xf32>
    %194 = arith.mulf %184, %165 : vector<2x32xf32>
    %195 = arith.addf %193, %194 : vector<2x32xf32>
    %c10_55 = arith.constant 10 : index
    %c0_56 = arith.constant 0 : index
    %196 = vector.load %arg12[%c10_55, %c0_56] : memref<16x32xf32, #tpu.memory_space<vmem>>, vector<2x32xf32>
    tpu.vector_store %arg12[%c10_55, %c0_56], %195 {strides = array<i32>} : memref<16x32xf32, #tpu.memory_space<vmem>>, vector<2x32xf32>,
    %c12 = arith.constant 12 : index
    %c0_57 = arith.constant 0 : index
    %197 = vector.load %arg11[%c12, %c0_57] : memref<16x96xf32, #tpu.memory_space<vmem>>, vector<2x96xf32>
    %cst_58 = arith.constant dense<0.000000e+00> : vector<2x96xf32>
    %198 = tpu.matmul %195, %12, %cst_58 {dimension_numbers = #tpu.dot_dimension_numbers<[1], [0], [0], [1], [0, 0, 1, 1], [], []>} : vector<2x32xf32>, vector<32x96xf32>, vector<2x96xf32> -> vector<2x96xf32>
    %199 = vector.extract_strided_slice %197 {offsets = [0, 0], sizes = [2, 32], strides = [1, 1]} : vector<2x96xf32> to vector<2x32xf32>
    %200 = vector.extract_strided_slice %198 {offsets = [0, 0], sizes = [2, 32], strides = [1, 1]} : vector<2x96xf32> to vector<2x32xf32>
    %201 = arith.addf %199, %200 : vector<2x32xf32>
    %202 = arith.negf %201 : vector<2x32xf32>
    %203 = math.exp %202 : vector<2x32xf32>
    %cst_59 = arith.constant 1.000000e+00 : f32
    %204 = vector.broadcast %cst_59 : f32 to vector<2x32xf32>
    %205 = arith.addf %204, %203 : vector<2x32xf32>
    %206 = arith.divf %204, %205 : vector<2x32xf32>
    %207 = vector.extract_strided_slice %197 {offsets = [0, 32], sizes = [2, 32], strides = [1, 1]} : vector<2x96xf32> to vector<2x32xf32>
    %208 = vector.extract_strided_slice %198 {offsets = [0, 32], sizes = [2, 32], strides = [1, 1]} : vector<2x96xf32> to vector<2x32xf32>
    %209 = arith.addf %207, %208 : vector<2x32xf32>
    %210 = arith.negf %209 : vector<2x32xf32>
    %211 = math.exp %210 : vector<2x32xf32>
    %cst_60 = arith.constant 1.000000e+00 : f32
    %212 = vector.broadcast %cst_60 : f32 to vector<2x32xf32>
    %213 = arith.addf %212, %211 : vector<2x32xf32>
    %214 = arith.divf %212, %213 : vector<2x32xf32>
    %215 = vector.extract_strided_slice %197 {offsets = [0, 64], sizes = [2, 32], strides = [1, 1]} : vector<2x96xf32> to vector<2x32xf32>
    %216 = vector.extract_strided_slice %198 {offsets = [0, 64], sizes = [2, 32], strides = [1, 1]} : vector<2x96xf32> to vector<2x32xf32>
    %217 = arith.addf %216, %15 : vector<2x32xf32>
    %218 = arith.mulf %206, %217 : vector<2x32xf32>
    %219 = arith.addf %215, %218 : vector<2x32xf32>
    %220 = math.tanh %219 : vector<2x32xf32>
    %cst_61 = arith.constant 1.000000e+00 : f32
    %221 = vector.broadcast %cst_61 : f32 to vector<2x32xf32>
    %222 = arith.subf %221, %214 : vector<2x32xf32>
    %223 = arith.mulf %222, %220 : vector<2x32xf32>
    %224 = arith.mulf %214, %195 : vector<2x32xf32>
    %225 = arith.addf %223, %224 : vector<2x32xf32>
    %c12_62 = arith.constant 12 : index
    %c0_63 = arith.constant 0 : index
    %226 = vector.load %arg12[%c12_62, %c0_63] : memref<16x32xf32, #tpu.memory_space<vmem>>, vector<2x32xf32>
    tpu.vector_store %arg12[%c12_62, %c0_63], %225 {strides = array<i32>} : memref<16x32xf32, #tpu.memory_space<vmem>>, vector<2x32xf32>,
    %c14 = arith.constant 14 : index
    %c0_64 = arith.constant 0 : index
    %227 = vector.load %arg11[%c14, %c0_64] : memref<16x96xf32, #tpu.memory_space<vmem>>, vector<2x96xf32>
    %cst_65 = arith.constant dense<0.000000e+00> : vector<2x96xf32>
    %228 = tpu.matmul %225, %12, %cst_65 {dimension_numbers = #tpu.dot_dimension_numbers<[1], [0], [0], [1], [0, 0, 1, 1], [], []>} : vector<2x32xf32>, vector<32x96xf32>, vector<2x96xf32> -> vector<2x96xf32>
    %229 = vector.extract_strided_slice %227 {offsets = [0, 0], sizes = [2, 32], strides = [1, 1]} : vector<2x96xf32> to vector<2x32xf32>
    %230 = vector.extract_strided_slice %228 {offsets = [0, 0], sizes = [2, 32], strides = [1, 1]} : vector<2x96xf32> to vector<2x32xf32>
    %231 = arith.addf %229, %230 : vector<2x32xf32>
    %232 = arith.negf %231 : vector<2x32xf32>
    %233 = math.exp %232 : vector<2x32xf32>
    %cst_66 = arith.constant 1.000000e+00 : f32
    %234 = vector.broadcast %cst_66 : f32 to vector<2x32xf32>
    %235 = arith.addf %234, %233 : vector<2x32xf32>
    %236 = arith.divf %234, %235 : vector<2x32xf32>
    %237 = vector.extract_strided_slice %227 {offsets = [0, 32], sizes = [2, 32], strides = [1, 1]} : vector<2x96xf32> to vector<2x32xf32>
    %238 = vector.extract_strided_slice %228 {offsets = [0, 32], sizes = [2, 32], strides = [1, 1]} : vector<2x96xf32> to vector<2x32xf32>
    %239 = arith.addf %237, %238 : vector<2x32xf32>
    %240 = arith.negf %239 : vector<2x32xf32>
    %241 = math.exp %240 : vector<2x32xf32>
    %cst_67 = arith.constant 1.000000e+00 : f32
    %242 = vector.broadcast %cst_67 : f32 to vector<2x32xf32>
    %243 = arith.addf %242, %241 : vector<2x32xf32>
    %244 = arith.divf %242, %243 : vector<2x32xf32>
    %245 = vector.extract_strided_slice %227 {offsets = [0, 64], sizes = [2, 32], strides = [1, 1]} : vector<2x96xf32> to vector<2x32xf32>
    %246 = vector.extract_strided_slice %228 {offsets = [0, 64], sizes = [2, 32], strides = [1, 1]} : vector<2x96xf32> to vector<2x32xf32>
    %247 = arith.addf %246, %15 : vector<2x32xf32>
    %248 = arith.mulf %236, %247 : vector<2x32xf32>
    %249 = arith.addf %245, %248 : vector<2x32xf32>
    %250 = math.tanh %249 : vector<2x32xf32>
    %cst_68 = arith.constant 1.000000e+00 : f32
    %251 = vector.broadcast %cst_68 : f32 to vector<2x32xf32>
    %252 = arith.subf %251, %244 : vector<2x32xf32>
    %253 = arith.mulf %252, %250 : vector<2x32xf32>
    %254 = arith.mulf %244, %225 : vector<2x32xf32>
    %255 = arith.addf %253, %254 : vector<2x32xf32>
    %c14_69 = arith.constant 14 : index
    %c0_70 = arith.constant 0 : index
    %256 = vector.load %arg12[%c14_69, %c0_70] : memref<16x32xf32, #tpu.memory_space<vmem>>, vector<2x32xf32>
    tpu.vector_store %arg12[%c14_69, %c0_70], %255 {strides = array<i32>} : memref<16x32xf32, #tpu.memory_space<vmem>>, vector<2x32xf32>,
    %c0_71 = arith.constant 0 : index
    %c0_72 = arith.constant 0 : index
    %257 = vector.load %arg12[%c0_71, %c0_72] : memref<16x32xf32, #tpu.memory_space<vmem>>, vector<16x32xf32>
    %c0_73 = arith.constant 0 : index
    %c0_74 = arith.constant 0 : index
    %258 = vector.load %arg7[%c0_73, %c0_74] : memref<32x128xf32, #tpu.memory_space<vmem>>, vector<32x128xf32>
    %cst_75 = arith.constant dense<0.000000e+00> : vector<16x128xf32>
    %259 = tpu.matmul %257, %258, %cst_75 {dimension_numbers = #tpu.dot_dimension_numbers<[1], [0], [0], [1], [0, 0, 1, 1], [], []>} : vector<16x32xf32>, vector<32x128xf32>, vector<16x128xf32> -> vector<16x128xf32>
    %c0_76 = arith.constant 0 : index
    %c0_77 = arith.constant 0 : index
    %260 = vector.load %arg8[%c0_76, %c0_77] : memref<1x128xf32, #tpu.memory_space<vmem>>, vector<1x128xf32>
    %261 = vector.broadcast %260 : vector<1x128xf32> to vector<16x128xf32>
    %262 = arith.addf %259, %261 : vector<16x128xf32>
    %c0_78 = arith.constant 0 : index
    %c0_79 = arith.constant 0 : index
    %263 = vector.load %arg9[%c0_78, %c0_79] : memref<16x128xf32, #tpu.memory_space<vmem>>, vector<16x128xf32>
    tpu.vector_store %arg9[%c0_78, %c0_79], %262 {strides = array<i32>} : memref<16x128xf32, #tpu.memory_space<vmem>>, vector<16x128xf32>,
    %c0_80 = arith.constant 0 : index
    %c0_81 = arith.constant 0 : index
    %264 = vector.load %arg10[%c0_80, %c0_81] : memref<2x32xf32, #tpu.memory_space<vmem>>, vector<2x32xf32>
    tpu.vector_store %arg10[%c0_80, %c0_81], %255 {strides = array<i32>} : memref<2x32xf32, #tpu.memory_space<vmem>>, vector<2x32xf32>,
    return
  }
  func.func @transform_0(%arg0: i32) -> (i32, i32) {
    %c0_i32 = arith.constant 0 : i32
    %c0_i32_0 = arith.constant 0 : i32
    %c0_i32_1 = arith.constant 0 : i32
    return %c0_i32, %c0_i32_0 : i32, i32
  }
  func.func @transform_1(%arg0: i32) -> (i32, i32) {
    %c0_i32 = arith.constant 0 : i32
    %c0_i32_0 = arith.constant 0 : i32
    %c0_i32_1 = arith.constant 0 : i32
    return %c0_i32, %c0_i32_0 : i32, i32
  }
  func.func @transform_2(%arg0: i32) -> (i32, i32) {
    %c0_i32 = arith.constant 0 : i32
    %c0_i32_0 = arith.constant 0 : i32
    %c0_i32_1 = arith.constant 0 : i32
    return %c0_i32, %c0_i32_0 : i32, i32
  }
  func.func @transform_3(%arg0: i32) -> (i32, i32) {
    %c0_i32 = arith.constant 0 : i32
    %c0_i32_0 = arith.constant 0 : i32
    %c0_i32_1 = arith.constant 0 : i32
    return %c0_i32, %c0_i32_0 : i32, i32
  }
  func.func @transform_4(%arg0: i32) -> (i32, i32) {
    %c0_i32 = arith.constant 0 : i32
    %c0_i32_0 = arith.constant 0 : i32
    %c0_i32_1 = arith.constant 0 : i32
    return %c0_i32, %c0_i32_0 : i32, i32
  }
  func.func @transform_5(%arg0: i32) -> (i32, i32) {
    %c0_i32 = arith.constant 0 : i32
    %c0_i32_0 = arith.constant 0 : i32
    %c0_i32_1 = arith.constant 0 : i32
    return %c0_i32, %c0_i32_0 : i32, i32
  }
  func.func @transform_6(%arg0: i32) -> (i32, i32) {
    %c0_i32 = arith.constant 0 : i32
    %c0_i32_0 = arith.constant 0 : i32
    %c0_i32_1 = arith.constant 0 : i32
    return %c0_i32, %c0_i32_0 : i32, i32
  }
  func.func @transform_7(%arg0: i32) -> (i32, i32) {
    %c0_i32 = arith.constant 0 : i32
    %c0_i32_0 = arith.constant 0 : i32
    %c0_i32_1 = arith.constant 0 : i32
    return %c0_i32, %c0_i32_0 : i32, i32
  }
  func.func @transform_8(%arg0: i32) -> (i32, i32) {
    %c0_i32 = arith.constant 0 : i32
    %c0_i32_0 = arith.constant 0 : i32
    %c0_i32_1 = arith.constant 0 : i32
    return %c0_i32, %c0_i32_0 : i32, i32
  }
  func.func @transform_9(%arg0: i32) -> (i32, i32) {
    %c0_i32 = arith.constant 0 : i32
    %c0_i32_0 = arith.constant 0 : i32
    %c0_i32_1 = arith.constant 0 : i32
    return %c0_i32, %c0_i32_0 : i32, i32
  }
}

</mosaic_0001>

<bundles_post_ra>
// kernel: tpu_custom_call.1
= control target key start
LH: loop header
LB: loop body
LE: loop exit
PB: predicated region body
PF: predicated region fallthrough
CT: control target
= control target key end

     0   :  { %15 = vsyncpa [#allocation5], 0  ;;  %s1748_s0 = inlined_call_operand.vmem [shape: f32[16,4], index: 0, kind: input, shape index: {}]   ;;  %s1749_s1 = inlined_call_operand.vmem [shape: f32[2,32], index: 1, kind: input, shape index: {}]   ;;  %s1750_s2 = inlined_call_operand.vmem [shape: f32[4,96], index: 2, kind: input, shape index: {}]   ;;  %s1751_s3 = inlined_call_operand.hbm [shape: f32[32,96], index: 3, kind: input, shape index: {}]   ;;  %s1752_s4 = inlined_call_operand.vmem [shape: f32[1,96], index: 4, kind: input, shape index: {}]   ;;  %s1753_s5 = inlined_call_operand.vmem [shape: f32[1,32], index: 5, kind: input, shape index: {}]   ;;  %s1754_s6 = inlined_call_operand.hbm [shape: f32[32,128], index: 6, kind: input, shape index: {}]   ;;  %s1755_s7 = inlined_call_operand.vmem [shape: f32[1,128], index: 7, kind: input, shape index: {}]   ;;  %s1756_s8 = inlined_call_operand.hbm [shape: f32[16,128], index: 8, kind: output, shape index: {0}]   ;;  %s1757_s9 = inlined_call_operand.hbm [shape: f32[2,32], index: 9, kind: output, shape index: {1}]  }
   0x1   :  { %16 = vsyncpa [#allocation8], 0 }
   0x2   :  { %17 = vsyncpa [#allocation6], 0 }
   0x3   :  { %18 = vsyncpa [#allocation11], 0  ;;  %s1495_s30 = smov [#allocation4]  }
   0x4   :  { %s30_s10 = sshll.u32 %s1495_s30, 4  ;;  %s31_s10 = int_to_ptr.vmem [resolvable:$true] %s30_s10 }
   0x5   :  { %s1415_s11 = scalar_lea.vmem %s31_s10, 512  ;;  %p1420_p1 = scmp.lt.s32.totalorder %s31_s10, %s31_s10 }
   0x6   :  { %p1416_p0 = scmp.ne.s32.totalorder %s31_s10, %s1415_s11  ;;  %p1421_p2 = scmp.lt.s32.totalorder %s1415_s11, %s1415_s11 }
   0x8   :  { %p1422_p3 = por %p1421_p2, %p1420_p1 }
   0xa   :  { %p1423_p4 = pnand %p1422_p3, %p1416_p0 }
   0xc   :  { %1426 = shalt.err (!%p1423_p4)
}
   0xd   :  { %s1496_s12 = smov 128   ;;  %s1497_s13 = smov 8  }
   0xe   :  { %36 = dma.hbm_to_vmem [thread:$0]  %s1751_s3, 512, %s31_s10, [#allocation5], %s1496_s12, %s1496_s12, %s1497_s13  }
   0xf   :  { %s1498_s16 = smov [#allocation7]  }
  0x10   :  { %s46_s17 = sshll.u32 %s1498_s16, 4  ;;  %s47_s17 = int_to_ptr.vmem [resolvable:$true] %s46_s17 }
  0x11   :  { %s1435_s18 = scalar_lea.vmem %s47_s17, 512  ;;  %p1440_p6 = scmp.lt.s32.totalorder %s47_s17, %s47_s17 }
  0x12   :  { %p1436_p5 = scmp.ne.s32.totalorder %s47_s17, %s1435_s18  ;;  %p1441_p7 = scmp.lt.s32.totalorder %s1435_s18, %s1435_s18 }
  0x14   :  { %p1442_p8 = por %p1441_p7, %p1440_p6 }
  0x16   :  { %p1443_p9 = pnand %p1442_p8, %p1436_p5 }
  0x18   :  { %1446 = shalt.err (!%p1443_p9)
}
  0x19   :  { %52 = dma.hbm_to_vmem [thread:$0]  %s1754_s6, 512, %s47_s17, [#allocation8], %s1496_s12, %s1496_s12, %s1497_s13  }
  0x1a   :  { %1487 = dma.done.wait [#allocation5], 512  }
  0x1b   :  { %1488 = vsyncadd [#allocation5], 4294966784 }
  0x1c   :  { %1489 = dma.done.wait [#allocation8], 512  }
  0x1d   :  { %1490 = vsyncadd [#allocation8], 4294966784  ;;  %v1499_v0 = vmov 0.0   ;;  %vm1500_vm0 = vmmov 0   ;;  %vm90_vm1 = vcmask 1043456   ;;  %v1571_v1 = vld [vmem:[#allocation4 + $0x18] sm:$0xff] }
  0x1e   :  { %1241 = vmatprep.subr.mxu1 %v1499_v0  ;;  %1249 = vmatprep.mubr.msk.f32.mxu1 %vm1500_vm0, %v1499_v0  ;;  %v1573_v2 = vld [vmem:[#allocation4 + $0x10] sm:$0xff]  ;;  %v1576_v3 = vld [vmem:[#allocation4 + $0x8] sm:$0xff]  ;;  %v75_v4 = vld [vmem:[%s1750_s2] sm:$0xf]  ;;  %s1501_s2 = smov 64   ;;  %vm184_vm2 = vcmask 261120  }
  0x1f   :  { %1242 = vmatpush3.msra.mxu1 %v1571_v1  ;;  %1236 = vmatprep.subr.msk.mxu0 %vm90_vm1, %v75_v4  ;;  %v61_v5 = vld [vmem:[%s1748_s0] sm:$0xff]  ;;  %v62_v6 = vld [vmem:[%s1748_s0 + $0x8] sm:$0xff]  ;;  %vm83_vm3 = vcmask 31744   ;;  %vm169_vm4 = vcmask 785408   ;;  %vm295_vm5 = vcmask 254976   ;;  %s1504_s29 = smov [#allocation10]  }
  0x20   :  { %1243 = vmatprep.subr.mxu1 %v1499_v0  ;;  %v1167_v7 = vld [vmem:[%s1753_s5] ss:$0 sm:$0xff]  ;;  %1237 = vmatpush3.msk.msra.mxu0 %vm90_vm1, %v75_v4  ;;  %v1161_v8 = vmul.f32 -1.442695, %v61_v5  ;;  %v1162_v9 = vmul.f32 -1.442695, %v62_v6 }
  0x21   :  { %1244 = vmatpush3.msra.mxu1 %v1573_v2  ;;  %v1593_v10 = vld [vmem:[#allocation4] sm:$0xff]  ;;  %265 = vrot.lane.b32.xlu0 %v1167_v7, %s1501_s2  ;;  %s1147_s30 = sshll.u32 %s1504_s29, 4  ;;  %s1148_s30 = int_to_ptr.vmem [resolvable:$true] %s1147_s30 }
  0x22   :  { %1245 = vmatprep.subr.mxu1 %v1499_v0  ;;  %v182_v11 = vld [vmem:[%s1749_s1] sm:$0x3]  ;;  %1351 = vpow2.f32 %v1161_v8  ;;  %1252 = vmatprep.subr.mxu0 %v1499_v0  ;;  %s1502_s1 = smov 32   ;;  %s1447_s10 = scalar_lea.vmem %s1148_s30, 32 }
  0x23   :  { %1246 = vmatpush3.msra.mxu1 %v1576_v3  ;;  %1353 = vpow2.f32 %v1162_v9  ;;  %v1163_v23 = vld [vmem:[%s1752_s4] ss:$0 sm:$0xff]  ;;  %s1503_s4 = smov 96   ;;  %p1448_p10 = scmp.ne.s32.totalorder %s1148_s30, %s1447_s10 }
  0x24   :  { %1247 = vmatprep.subr.mxu1 %v1499_v0  ;;  %p1452_p11 = scmp.lt.s32.totalorder %s1148_s30, %s1148_s30  ;;  %p1453_p12 = scmp.lt.s32.totalorder %s1447_s10, %s1447_s10 }
  0x25   :  { %1248 = vmatpush3.msra.mxu1 %v1593_v10 }
  0x26   :  { %1250 = vmatmul.mubr.msk.f32.vlgmr.msra.gmra.mxu1 %vm184_vm2, %v182_v11  ;;  %1263 = vmatprep.subr.mxu1 %v1499_v0  ;;  %p1454_p13 = por %p1453_p12, %p1452_p11 }
  0x27   :  { %1264 = vmatpush3.msra.mxu1 %v1571_v1  ;;  %1271 = vmatprep.mubr.msk.f32.mxu1 %vm1500_vm0, %v1499_v0 }
  0x28   :  { %1265 = vmatprep.subr.mxu1 %v1499_v0  ;;  %p1455_p0 = pnand %p1454_p13, %p1448_p10 }
  0x29   :  { %1266 = vmatpush3.msra.mxu1 %v1573_v2 }
  0x2a   :  { %1267 = vmatprep.subr.mxu1 %v1499_v0 }
  0x2b   :  { %1268 = vmatpush3.msra.mxu1 %v1576_v3 }
  0x2c   :  { %1269 = vmatprep.subr.mxu1 %v1499_v0 }
  0x2d   :  { %1270 = vmatpush3.msra.mxu1 %v1593_v10 }
  0x2e   :  { %1285 = vmatprep.subr.mxu1 %v1499_v0 }
  0x2f   :  { %v1352_v12 = vpop.eup %1351 }
  0x30   :  { %v1354_v13 = vpop.eup %1353  ;;  %v69_v14 = vadd.f32 1.0, %v1352_v12 }
  0x31   :  { %v70_v15 = vadd.f32 1.0, %v1354_v13 }
  0x32   :  { %1355 = vrcp.f32 %v69_v14 }
  0x33   :  { %1357 = vrcp.f32 %v70_v15 }
  0x3f   :  { %v1356_v16 = vpop.eup %1355 }
  0x40   :  { %v1358_v17 = vpop.eup %1357  ;;  %1238 = vmatprep.mubr.msk.f32.mxu0 %vm83_vm3, %v1356_v16 }
  0x41   :  { %1239 = vmatmul.mubr.msk.f32.vlgmr.msra.gmra.mxu0 %vm83_vm3, %v1358_v17 }
  0x42   :  { %1253 = vmatpush3.msra.mxu0 %v1571_v1  ;;  %1260 = vmatprep.mubr.msk.f32.mxu0 %vm1500_vm0, %v1499_v0 }
  0x43   :  { %1254 = vmatprep.subr.mxu0 %v1499_v0 }
  0x44   :  { %1255 = vmatpush3.msra.mxu0 %v1573_v2 }
  0x45   :  { %1256 = vmatprep.subr.mxu0 %v1499_v0 }
  0x46   :  { %1257 = vmatpush3.msra.mxu0 %v1576_v3 }
  0x47   :  { %1258 = vmatprep.subr.mxu0 %v1499_v0 }
  0x48   :  { %1259 = vmatpush3.msra.mxu0 %v1593_v10 }
  0x49   :  { %1274 = vmatprep.subr.mxu0 %v1499_v0 }
  0x93   :  { %v1625_v18 = vpop.permute.xlu0 %265 }
  0xe6   :  { %v254_v19 = vpop.f32.mrf.mxu1 }
  0xe7   :  { %v268_v20 = vadd.f32 %v1625_v18, %v254_v19 }
  0xe8   :  { %v1251_v21 = vpop.f32.mrf.mxu1 }
  0xe9   :  { %270 = vrot.lane.b32.xlu0 %v268_v20, %s1501_s2 }
  0xed   :  { %286 = vrot.lane.b32.xlu0 %v182_v11, %s1502_s1 }
 0x101   :  { %v1240_v22 = vpop.f32.mrf.mxu0 }
 0x102   :  { %v166_v24 = vadd.f32 %v1240_v22, %v1163_v23 }
 0x103   :  { %v160_v25 = vpop.f32.mrf.mxu0 }
 0x104   :  { %171 = vst.msk [vmem:[#allocation2 + $0x8] sm:$0xff] %vm169_vm4, %v166_v24  ;;  %v161_v26 = vadd.f32 %v1163_v23, %v160_v25 }
 0x106   :  { %170 = vst.msk [vmem:[#allocation2] sm:$0xff] %vm169_vm4, %v161_v26 }
 0x10d   :  { %v183_v27 = vld [vmem:[#allocation2] sm:$0x3]  ;;  %v297_v48 = vld [vmem:[#allocation2 + $0x2] sm:$0x3]  ;;  %v402_v8 = vld [vmem:[#allocation2 + $0x4] sm:$0x3] }
 0x10e   :  { %v258_v28 = vadd.f32 %v254_v19, %v183_v27 }
 0x110   :  { %v1169_v29 = vmul.f32 -1.442695, %v258_v28 }
 0x112   :  { %1359 = vpow2.f32 %v1169_v29 }
 0x11f   :  { %v1360_v30 = vpop.eup %1359 }
 0x120   :  { %v262_v31 = vadd.f32 1.0, %v1360_v30  ;;  %v507_v30 = vld [vmem:[#allocation2 + $0x6] sm:$0x3] }
 0x122   :  { %1361 = vrcp.f32 %v262_v31 }
 0x12f   :  { %v1362_v32 = vpop.eup %1361 }
 0x130   :  { %v280_v39 = vsub.f32 1.0, %v1362_v32 }
 0x15b   :  { %v271_v33 = vpop.permute.xlu0 %270 }
 0x15c   :  { %v273_v34 = vmul.f32 %v1362_v32, %v271_v33 }
 0x15e   :  { %275 = vrot.lane.b32.xlu1 %v273_v34, %s1501_s2 }
 0x15f   :  { %v287_v38 = vpop.permute.xlu0 %286 }
 0x160   :  { %v289_v41 = vmul.f32 %v1362_v32, %v287_v38 }
 0x1d0   :  { %v276_v35 = vpop.permute.xlu1 %275 }
 0x1d1   :  { %v278_v36 = vadd.f32 %v276_v35, %v183_v27 }
 0x1d3   :  { %1363 = vtanh.f32 %v278_v36 }
 0x1e0   :  { %v1364_v37 = vpop.eup %1363 }
 0x1e1   :  { %282 = vrot.lane.b32.xlu1 %v1364_v37, %s1503_s4 }
 0x253   :  { %v283_v40 = vpop.permute.xlu1 %282 }
 0x254   :  { %v285_v42 = vmul.f32 %v283_v40, %v280_v39 }
 0x256   :  { %v290_v43 = vadd.f32 %v289_v41, %v285_v42 }
 0x258   :  { %292 = vrot.lane.b32.xlu1 %v290_v43, %s1503_s4 }
 0x2ca   :  { %v293_v44 = vpop.permute.xlu1 %292 }
 0x2cb   :  { %296 = vst.msk [vmem:[#allocation3] sm:$0x3] %vm295_vm5, %v293_v44  ;;  %1261 = vmatmul.mubr.msk.f32.vlgmr.msra.gmra.mxu0 %vm184_vm2, %v293_v44 }
 0x2cc   :  { %1275 = vmatpush3.msra.mxu0 %v1571_v1  ;;  %1282 = vmatprep.mubr.msk.f32.mxu0 %vm1500_vm0, %v1499_v0 }
 0x2cd   :  { %1276 = vmatprep.subr.mxu0 %v1499_v0 }
 0x2ce   :  { %1277 = vmatpush3.msra.mxu0 %v1573_v2 }
 0x2cf   :  { %1278 = vmatprep.subr.mxu0 %v1499_v0 }
 0x2d0   :  { %1279 = vmatpush3.msra.mxu0 %v1576_v3 }
 0x2d1   :  { %1280 = vmatprep.subr.mxu0 %v1499_v0 }
 0x2d2   :  { %1281 = vmatpush3.msra.mxu0 %v1593_v10 }
 0x2d3   :  { %1296 = vmatprep.subr.mxu0 %v1499_v0 }
 0x38b   :  { %v366_v45 = vpop.f32.mrf.mxu0 }
 0x38c   :  { %v377_v46 = vadd.f32 %v366_v45, %v1625_v18  ;;  %v370_v49 = vadd.f32 %v366_v45, %v297_v48 }
 0x38d   :  { %v1262_v47 = vpop.f32.mrf.mxu0 }
 0x38e   :  { %379 = vrot.lane.b32.xlu0 %v377_v46, %s1501_s2  ;;  %v1171_v50 = vmul.f32 -1.442695, %v370_v49 }
 0x390   :  { %1365 = vpow2.f32 %v1171_v50  ;;  %v612_v50 = vld [vmem:[#allocation2 + $0x8] sm:$0x3] }
 0x39d   :  { %v1366_v51 = vpop.eup %1365 }
 0x39e   :  { %v374_v52 = vadd.f32 1.0, %v1366_v51 }
 0x3a0   :  { %1367 = vrcp.f32 %v374_v52 }
 0x3ad   :  { %v1368_v53 = vpop.eup %1367 }
 0x3ae   :  { %v389_v59 = vsub.f32 1.0, %v1368_v53  ;;  %v395_v61 = vmul.f32 %v1368_v53, %v290_v43 }
 0x400   :  { %v380_v54 = vpop.permute.xlu0 %379 }
 0x401   :  { %v382_v55 = vmul.f32 %v1368_v53, %v380_v54 }
 0x403   :  { %384 = vrot.lane.b32.xlu1 %v382_v55, %s1501_s2 }
 0x475   :  { %v385_v56 = vpop.permute.xlu1 %384 }
 0x476   :  { %v387_v57 = vadd.f32 %v385_v56, %v297_v48 }
 0x478   :  { %1369 = vtanh.f32 %v387_v57 }
 0x485   :  { %v1370_v58 = vpop.eup %1369 }
 0x486   :  { %391 = vrot.lane.b32.xlu0 %v1370_v58, %s1503_s4 }
 0x4f8   :  { %v392_v60 = vpop.permute.xlu0 %391 }
 0x4f9   :  { %v394_v62 = vmul.f32 %v392_v60, %v389_v59 }
 0x4fb   :  { %v396_v63 = vadd.f32 %v395_v61, %v394_v62 }
 0x4fd   :  { %398 = vrot.lane.b32.xlu1 %v396_v63, %s1503_s4 }
 0x56f   :  { %v399_v4 = vpop.permute.xlu1 %398 }
 0x570   :  { %401 = vst.msk [vmem:[#allocation3 + $0x2] sm:$0x3] %vm295_vm5, %v399_v4  ;;  %1272 = vmatmul.mubr.msk.f32.vlgmr.msra.gmra.mxu1 %vm184_vm2, %v399_v4 }
 0x571   :  { %1286 = vmatpush3.msra.mxu1 %v1571_v1  ;;  %1293 = vmatprep.mubr.msk.f32.mxu1 %vm1500_vm0, %v1499_v0 }
 0x572   :  { %1287 = vmatprep.subr.mxu1 %v1499_v0 }
 0x573   :  { %1288 = vmatpush3.msra.mxu1 %v1573_v2 }
 0x574   :  { %1289 = vmatprep.subr.mxu1 %v1499_v0 }
 0x575   :  { %1290 = vmatpush3.msra.mxu1 %v1576_v3 }
 0x576   :  { %1291 = vmatprep.subr.mxu1 %v1499_v0 }
 0x577   :  { %1292 = vmatpush3.msra.mxu1 %v1593_v10 }
 0x578   :  { %1307 = vmatprep.subr.mxu1 %v1499_v0 }
 0x630   :  { %v471_v5 = vpop.f32.mrf.mxu1 }
 0x631   :  { %v482_v6 = vadd.f32 %v471_v5, %v1625_v18  ;;  %v475_v9 = vadd.f32 %v471_v5, %v402_v8 }
 0x632   :  { %v1273_v7 = vpop.f32.mrf.mxu1 }
 0x633   :  { %484 = vrot.lane.b32.xlu0 %v482_v6, %s1501_s2  ;;  %v1173_v11 = vmul.f32 -1.442695, %v475_v9 }
 0x635   :  { %1371 = vpow2.f32 %v1173_v11 }
 0x642   :  { %v1372_v12 = vpop.eup %1371 }
 0x643   :  { %v479_v13 = vadd.f32 1.0, %v1372_v12 }
 0x645   :  { %1373 = vrcp.f32 %v479_v13 }
 0x652   :  { %v1374_v14 = vpop.eup %1373 }
 0x653   :  { %v494_v21 = vsub.f32 1.0, %v1374_v14  ;;  %v500_v23 = vmul.f32 %v1374_v14, %v396_v63 }
 0x6a5   :  { %v485_v15 = vpop.permute.xlu0 %484 }
 0x6a6   :  { %v487_v16 = vmul.f32 %v1374_v14, %v485_v15 }
 0x6a8   :  { %489 = vrot.lane.b32.xlu1 %v487_v16, %s1501_s2 }
 0x71a   :  { %v490_v17 = vpop.permute.xlu1 %489 }
 0x71b   :  { %v492_v19 = vadd.f32 %v490_v17, %v402_v8 }
 0x71d   :  { %1375 = vtanh.f32 %v492_v19 }
 0x72a   :  { %v1376_v20 = vpop.eup %1375 }
 0x72b   :  { %496 = vrot.lane.b32.xlu0 %v1376_v20, %s1503_s4 }
 0x79d   :  { %v497_v22 = vpop.permute.xlu0 %496 }
 0x79e   :  { %v499_v24 = vmul.f32 %v497_v22, %v494_v21 }
 0x7a0   :  { %v501_v25 = vadd.f32 %v500_v23, %v499_v24 }
 0x7a2   :  { %503 = vrot.lane.b32.xlu1 %v501_v25, %s1503_s4 }
 0x814   :  { %v504_v26 = vpop.permute.xlu1 %503 }
 0x815   :  { %506 = vst.msk [vmem:[#allocation3 + $0x4] sm:$0x3] %vm295_vm5, %v504_v26  ;;  %1283 = vmatmul.mubr.msk.f32.vlgmr.msra.gmra.mxu0 %vm184_vm2, %v504_v26 }
 0x816   :  { %1297 = vmatpush3.msra.mxu0 %v1571_v1  ;;  %1304 = vmatprep.mubr.msk.f32.mxu0 %vm1500_vm0, %v1499_v0 }
 0x817   :  { %1298 = vmatprep.subr.mxu0 %v1499_v0 }
 0x818   :  { %1299 = vmatpush3.msra.mxu0 %v1573_v2 }
 0x819   :  { %1300 = vmatprep.subr.mxu0 %v1499_v0 }
 0x81a   :  { %1301 = vmatpush3.msra.mxu0 %v1576_v3 }
 0x81b   :  { %1302 = vmatprep.subr.mxu0 %v1499_v0 }
 0x81c   :  { %1303 = vmatpush3.msra.mxu0 %v1593_v10 }
 0x81d   :  { %1318 = vmatprep.subr.mxu0 %v1499_v0 }
 0x8d5   :  { %v576_v27 = vpop.f32.mrf.mxu0 }
 0x8d6   :  { %v587_v28 = vadd.f32 %v576_v27, %v1625_v18  ;;  %v580_v31 = vadd.f32 %v576_v27, %v507_v30 }
 0x8d7   :  { %v1284_v29 = vpop.f32.mrf.mxu0 }
 0x8d8   :  { %589 = vrot.lane.b32.xlu0 %v587_v28, %s1501_s2  ;;  %v1175_v32 = vmul.f32 -1.442695, %v580_v31  ;;  %v822_v28 = vld [vmem:[#allocation2 + $0xc] sm:$0x3] }
 0x8da   :  { %1377 = vpow2.f32 %v1175_v32 }
 0x8e7   :  { %v1378_v33 = vpop.eup %1377 }
 0x8e8   :  { %v584_v34 = vadd.f32 1.0, %v1378_v33 }
 0x8ea   :  { %1379 = vrcp.f32 %v584_v34 }
 0x8f7   :  { %v1380_v35 = vpop.eup %1379 }
 0x8f8   :  { %v599_v41 = vsub.f32 1.0, %v1380_v35  ;;  %v605_v43 = vmul.f32 %v1380_v35, %v501_v25 }
 0x94a   :  { %v590_v36 = vpop.permute.xlu0 %589 }
 0x94b   :  { %v592_v37 = vmul.f32 %v1380_v35, %v590_v36 }
 0x94d   :  { %594 = vrot.lane.b32.xlu1 %v592_v37, %s1501_s2 }
 0x9bf   :  { %v595_v38 = vpop.permute.xlu1 %594 }
 0x9c0   :  { %v597_v39 = vadd.f32 %v595_v38, %v507_v30 }
 0x9c2   :  { %1381 = vtanh.f32 %v597_v39 }
 0x9cf   :  { %v1382_v40 = vpop.eup %1381 }
 0x9d0   :  { %601 = vrot.lane.b32.xlu0 %v1382_v40, %s1503_s4 }
 0xa42   :  { %v602_v42 = vpop.permute.xlu0 %601 }
 0xa43   :  { %v604_v44 = vmul.f32 %v602_v42, %v599_v41 }
 0xa45   :  { %v606_v45 = vadd.f32 %v605_v43, %v604_v44 }
 0xa47   :  { %608 = vrot.lane.b32.xlu1 %v606_v45, %s1503_s4 }
 0xab9   :  { %v609_v46 = vpop.permute.xlu1 %608 }
 0xaba   :  { %611 = vst.msk [vmem:[#allocation3 + $0x6] sm:$0x3] %vm295_vm5, %v609_v46  ;;  %1294 = vmatmul.mubr.msk.f32.vlgmr.msra.gmra.mxu1 %vm184_vm2, %v609_v46 }
 0xabb   :  { %1308 = vmatpush3.msra.mxu1 %v1571_v1  ;;  %1315 = vmatprep.mubr.msk.f32.mxu1 %vm1500_vm0, %v1499_v0 }
 0xabc   :  { %1309 = vmatprep.subr.mxu1 %v1499_v0 }
 0xabd   :  { %1310 = vmatpush3.msra.mxu1 %v1573_v2 }
 0xabe   :  { %1311 = vmatprep.subr.mxu1 %v1499_v0 }
 0xabf   :  { %1312 = vmatpush3.msra.mxu1 %v1576_v3 }
 0xac0   :  { %1313 = vmatprep.subr.mxu1 %v1499_v0 }
 0xac1   :  { %1314 = vmatpush3.msra.mxu1 %v1593_v10  ;;  %v1032_v24 = vld [vmem:[#allocation3] sm:$0xff] }
 0xb7a   :  { %v681_v47 = vpop.f32.mrf.mxu1 }
 0xb7b   :  { %v692_v48 = vadd.f32 %v681_v47, %v1625_v18  ;;  %v685_v51 = vadd.f32 %v681_v47, %v612_v50 }
 0xb7c   :  { %v1295_v49 = vpop.f32.mrf.mxu1 }
 0xb7d   :  { %694 = vrot.lane.b32.xlu0 %v692_v48, %s1501_s2  ;;  %v1177_v52 = vmul.f32 -1.442695, %v685_v51  ;;  %v927_v48 = vld [vmem:[#allocation2 + $0xe] sm:$0x3] }
 0xb7f   :  { %1383 = vpow2.f32 %v1177_v52 }
 0xb8c   :  { %v1384_v53 = vpop.eup %1383 }
 0xb8d   :  { %v689_v54 = vadd.f32 1.0, %v1384_v53 }
 0xb8f   :  { %1385 = vrcp.f32 %v689_v54 }
 0xb9c   :  { %v1386_v55 = vpop.eup %1385 }
 0xb9d   :  { %v704_v61 = vsub.f32 1.0, %v1386_v55  ;;  %v710_v63 = vmul.f32 %v1386_v55, %v606_v45 }
 0xbef   :  { %v695_v56 = vpop.permute.xlu0 %694 }
 0xbf0   :  { %v697_v57 = vmul.f32 %v1386_v55, %v695_v56 }
 0xbf2   :  { %699 = vrot.lane.b32.xlu1 %v697_v57, %s1501_s2 }
 0xc64   :  { %v700_v58 = vpop.permute.xlu1 %699 }
 0xc65   :  { %v702_v59 = vadd.f32 %v700_v58, %v612_v50 }
 0xc67   :  { %1387 = vtanh.f32 %v702_v59  ;;  %v1036_v59 = vld [vmem:[#allocation7 + $0x10] sm:$0xff] }
 0xc74   :  { %v1388_v60 = vpop.eup %1387 }
 0xc75   :  { %706 = vrot.lane.b32.xlu0 %v1388_v60, %s1503_s4  ;;  %v1035_v60 = vld [vmem:[#allocation7 + $0x8] sm:$0xff] }
 0xce7   :  { %v707_v62 = vpop.permute.xlu0 %706 }
 0xce8   :  { %v709_v4 = vmul.f32 %v707_v62, %v704_v61  ;;  %v1034_v61 = vld [vmem:[#allocation7] sm:$0xff] }
 0xcea   :  { %v711_v5 = vadd.f32 %v710_v63, %v709_v4 }
 0xcec   :  { %713 = vrot.lane.b32.xlu1 %v711_v5, %s1503_s4 }
 0xd5e   :  { %v714_v6 = vpop.permute.xlu1 %713 }
 0xd5f   :  { %716 = vst.msk [vmem:[#allocation3 + $0x8] sm:$0x3] %vm295_vm5, %v714_v6  ;;  %1305 = vmatmul.mubr.msk.f32.vlgmr.msra.gmra.mxu0 %vm184_vm2, %v714_v6 }
 0xd60   :  { %1319 = vmatpush3.msra.mxu0 %v1571_v1  ;;  %1326 = vmatprep.mubr.msk.f32.mxu0 %vm1500_vm0, %v1499_v0  ;;  %v717_v1 = vld [vmem:[#allocation2 + $0xa] sm:$0x3] }
 0xd61   :  { %1320 = vmatprep.subr.mxu0 %v1499_v0 }
 0xd62   :  { %1321 = vmatpush3.msra.mxu0 %v1573_v2 }
 0xd63   :  { %1322 = vmatprep.subr.mxu0 %v1499_v0 }
 0xd64   :  { %1323 = vmatpush3.msra.mxu0 %v1576_v3 }
 0xd65   :  { %1324 = vmatprep.subr.mxu0 %v1499_v0 }
 0xd66   :  { %1325 = vmatpush3.msra.mxu0 %v1593_v10 }
 0xe1f   :  { %v786_v7 = vpop.f32.mrf.mxu0 }
 0xe20   :  { %v797_v8 = vadd.f32 %v786_v7, %v1625_v18  ;;  %v790_v11 = vadd.f32 %v786_v7, %v717_v1 }
 0xe21   :  { %v1306_v9 = vpop.f32.mrf.mxu0 }
 0xe22   :  { %799 = vrot.lane.b32.xlu0 %v797_v8, %s1501_s2  ;;  %v1179_v12 = vmul.f32 -1.442695, %v790_v11 }
 0xe24   :  { %1389 = vpow2.f32 %v1179_v12 }
 0xe31   :  { %v1390_v13 = vpop.eup %1389 }
 0xe32   :  { %v794_v2 = vadd.f32 1.0, %v1390_v13 }
 0xe34   :  { %1391 = vrcp.f32 %v794_v2 }
 0xe41   :  { %v1392_v14 = vpop.eup %1391 }
 0xe42   :  { %v809_v17 = vsub.f32 1.0, %v1392_v14  ;;  %v815_v20 = vmul.f32 %v1392_v14, %v711_v5 }
 0xe94   :  { %v800_v15 = vpop.permute.xlu0 %799 }
 0xe95   :  { %v802_v3 = vmul.f32 %v1392_v14, %v800_v15 }
 0xe97   :  { %804 = vrot.lane.b32.xlu1 %v802_v3, %s1501_s2 }
 0xf09   :  { %v805_v0 = vpop.permute.xlu1 %804 }
 0xf0a   :  { %v807_v10 = vadd.f32 %v805_v0, %v717_v1 }
 0xf0c   :  { %1393 = vtanh.f32 %v807_v10 }
 0xf19   :  { %v1394_v16 = vpop.eup %1393 }
 0xf1a   :  { %811 = vrot.lane.b32.xlu0 %v1394_v16, %s1503_s4 }
 0xf8c   :  { %v812_v19 = vpop.permute.xlu0 %811 }
 0xf8d   :  { %v814_v21 = vmul.f32 %v812_v19, %v809_v17 }
 0xf8f   :  { %v816_v22 = vadd.f32 %v815_v20, %v814_v21 }
 0xf91   :  { %818 = vrot.lane.b32.xlu1 %v816_v22, %s1503_s4 }
0x1003   :  { %v819_v23 = vpop.permute.xlu1 %818 }
0x1004   :  { %821 = vst.msk [vmem:[#allocation3 + $0xa] sm:$0x3] %vm295_vm5, %v819_v23  ;;  %1316 = vmatmul.mubr.msk.f32.vlgmr.msra.gmra.mxu1 %vm184_vm2, %v819_v23 }
0x1005   :  { %1337 = vmatprep.mubr.msk.f32.mxu1 %vm184_vm2, %v1032_v24 }
0x10c4   :  { %v891_v25 = vpop.f32.mrf.mxu1 }
0x10c5   :  { %v902_v26 = vadd.f32 %v891_v25, %v1625_v18  ;;  %v895_v29 = vadd.f32 %v891_v25, %v822_v28 }
0x10c6   :  { %v1317_v27 = vpop.f32.mrf.mxu1 }
0x10c7   :  { %904 = vrot.lane.b32.xlu0 %v902_v26, %s1501_s2  ;;  %v1181_v30 = vmul.f32 -1.442695, %v895_v29 }
0x10c9   :  { %1395 = vpow2.f32 %v1181_v30 }
0x10d6   :  { %v1396_v31 = vpop.eup %1395 }
0x10d7   :  { %v899_v32 = vadd.f32 1.0, %v1396_v31 }
0x10d9   :  { %1397 = vrcp.f32 %v899_v32 }
0x10e6   :  { %v1398_v33 = vpop.eup %1397 }
0x10e7   :  { %v914_v39 = vsub.f32 1.0, %v1398_v33  ;;  %v920_v41 = vmul.f32 %v1398_v33, %v816_v22 }
0x1139   :  { %v905_v34 = vpop.permute.xlu0 %904 }
0x113a   :  { %v907_v35 = vmul.f32 %v1398_v33, %v905_v34 }
0x113c   :  { %909 = vrot.lane.b32.xlu1 %v907_v35, %s1501_s2 }
0x11ae   :  { %v910_v36 = vpop.permute.xlu1 %909 }
0x11af   :  { %v912_v37 = vadd.f32 %v910_v36, %v822_v28 }
0x11b1   :  { %1399 = vtanh.f32 %v912_v37 }
0x11be   :  { %v1400_v38 = vpop.eup %1399 }
0x11bf   :  { %916 = vrot.lane.b32.xlu0 %v1400_v38, %s1503_s4 }
0x1231   :  { %v917_v40 = vpop.permute.xlu0 %916 }
0x1232   :  { %v919_v42 = vmul.f32 %v917_v40, %v914_v39 }
0x1234   :  { %v921_v43 = vadd.f32 %v920_v41, %v919_v42 }
0x1236   :  { %923 = vrot.lane.b32.xlu1 %v921_v43, %s1503_s4 }
0x12a8   :  { %v924_v44 = vpop.permute.xlu1 %923 }
0x12a9   :  { %926 = vst.msk [vmem:[#allocation3 + $0xc] sm:$0x3] %vm295_vm5, %v924_v44  ;;  %1327 = vmatmul.mubr.msk.f32.vlgmr.msra.gmra.mxu0 %vm184_vm2, %v924_v44 }
0x1369   :  { %v996_v45 = vpop.f32.mrf.mxu0 }
0x136a   :  { %v1007_v46 = vadd.f32 %v996_v45, %v1625_v18  ;;  %v1000_v49 = vadd.f32 %v996_v45, %v927_v48  ;;  %v1037_v18 = vld [vmem:[#allocation7 + $0x18] sm:$0xff] }
0x136b   :  { %v1328_v47 = vpop.f32.mrf.mxu0  ;;  %1329 = vmatprep.subr.mxu1 %v1037_v18 }
0x136c   :  { %1009 = vrot.lane.b32.xlu0 %v1007_v46, %s1501_s2  ;;  %v1183_v50 = vmul.f32 -1.442695, %v1000_v49  ;;  %1330 = vmatpush3.msra.mxu1 %v1037_v18 }
0x136d   :  { %1331 = vmatprep.subr.mxu1 %v1036_v59 }
0x136e   :  { %1401 = vpow2.f32 %v1183_v50  ;;  %1332 = vmatpush3.msra.mxu1 %v1036_v59 }
0x136f   :  { %1333 = vmatprep.subr.mxu1 %v1035_v60 }
0x1370   :  { %1334 = vmatpush3.msra.mxu1 %v1035_v60 }
0x1371   :  { %1335 = vmatprep.subr.mxu1 %v1034_v61 }
0x1372   :  { %1336 = vmatpush3.msra.mxu1 %v1034_v61 }
0x137b   :  { %v1402_v51 = vpop.eup %1401 }
0x137c   :  { %v1004_v52 = vadd.f32 1.0, %v1402_v51 }
0x137e   :  { %1403 = vrcp.f32 %v1004_v52 }
0x138b   :  { %v1404_v53 = vpop.eup %1403 }
0x138c   :  { %v1019_v62 = vsub.f32 1.0, %v1404_v53  ;;  %v1025_v4 = vmul.f32 %v1404_v53, %v921_v43 }
0x13de   :  { %v1010_v54 = vpop.permute.xlu0 %1009 }
0x13df   :  { %v1012_v55 = vmul.f32 %v1404_v53, %v1010_v54 }
0x13e1   :  { %1014 = vrot.lane.b32.xlu1 %v1012_v55, %s1501_s2 }
0x1453   :  { %v1015_v56 = vpop.permute.xlu1 %1014 }
0x1454   :  { %v1017_v57 = vadd.f32 %v1015_v56, %v927_v48 }
0x1456   :  { %1405 = vtanh.f32 %v1017_v57 }
0x1463   :  { %v1406_v58 = vpop.eup %1405 }
0x1464   :  { %1021 = vrot.lane.b32.xlu0 %v1406_v58, %s1503_s4 }
0x14d6   :  { %v1022_v63 = vpop.permute.xlu0 %1021 }
0x14d7   :  { %v1024_v5 = vmul.f32 %v1022_v63, %v1019_v62 }
0x14d9   :  { %v1026_v6 = vadd.f32 %v1025_v4, %v1024_v5 }
0x14db   :  { %1028 = vrot.lane.b32.xlu1 %v1026_v6, %s1503_s4 }
0x154d   :  { %v1029_v7 = vpop.permute.xlu1 %1028 }
0x154e   :  { %1031 = vst.msk [vmem:[#allocation3 + $0xe] sm:$0x3] %vm295_vm5, %v1029_v7  ;;  %1128 = vst.msk [vmem:[#allocation10] sm:$0x3] %vm295_vm5, %v1029_v7 }
0x1555   :  { %v1033_v8 = vld [vmem:[#allocation3 + $0x8] sm:$0xff] }
0x1556   :  { %1338 = vmatmul.mubr.msk.f32.vlgmr.msra.gmra.mxu1 %vm184_vm2, %v1033_v8 }
0x1557   :  { %1458 = shalt.err (!%p1455_p0)
}
0x1558   :  { %1150 = dma.vmem_to_hbm [thread:$0]  %s1148_s30, 32, %s1757_s9, [#allocation11]   ;;  %v1184_v9 = vld [vmem:[%s1755_s7] ss:$0 sm:$0xff] }
0x1559   :  { %s1505_s17 = smov [#allocation9]  }
0x155a   :  { %s1134_s18 = sshll.u32 %s1505_s17, 4  ;;  %s1135_s18 = int_to_ptr.vmem [resolvable:$true] %s1134_s18 }
0x155b   :  { %s1467_s19 = scalar_lea.vmem %s1135_s18, 256  ;;  %p1472_p2 = scmp.lt.s32.totalorder %s1135_s18, %s1135_s18 }
0x155c   :  { %p1468_p1 = scmp.ne.s32.totalorder %s1135_s18, %s1467_s19  ;;  %p1473_p3 = scmp.lt.s32.totalorder %s1467_s19, %s1467_s19 }
0x155e   :  { %p1474_p4 = por %p1473_p3, %p1472_p2 }
0x1560   :  { %p1475_p5 = pnand %p1474_p4, %p1468_p1 }
0x1616   :  { %v1339_v1 = vpop.f32.mrf.mxu1 }
0x1617   :  { %v1123_v11 = vadd.f32 %v1339_v1, %v1184_v9 }
0x1618   :  { %v1117_v12 = vpop.f32.mrf.mxu1 }
0x1619   :  { %1127 = vst [vmem:[#allocation9 + $0x8] sm:$0xff] %v1123_v11  ;;  %v1118_v13 = vadd.f32 %v1184_v9, %v1117_v12 }
0x161b   :  { %1126 = vst [vmem:[#allocation9] sm:$0xff] %v1118_v13 }
0x161c   :  { %1478 = shalt.err (!%p1475_p5)
}
0x161d   :  { %1140 = dma.vmem_to_hbm [thread:$0]  %s1135_s18, 256, %s1756_s8, [#allocation6], %s1496_s12, %s1496_s12, %s1497_s13  }
0x161e   :  { %1491 = dma.done.wait [#allocation6], 256  }
0x161f   :  { %1492 = vsyncadd [#allocation6], 4294967040 }
0x1620   :  { %1493 = dma.done.wait [#allocation11], 32  }
0x1621   :  { %1494 = vsyncadd [#allocation11], 4294967264 }
0x1622   :  { %1157 = vsyncpa [#allocation5], 1 }
0x1623   :  { %1158 = vsyncpa [#allocation8], 1 }
0x1624   :  { %1159 = vsyncpa [#allocation6], 1 }
0x1625   :  { %1160 = vsyncpa [#allocation11], 1 }

</bundles_post_ra>
